<compile_context>
chip_gen: v5e
topology: v5e:2x2
jax: 0.10.0
libtpu: 0.0.40
codegen_flags: <defaults>
</compile_context>

<pallas_src>
import math

import jax
import jax.numpy as jnp
from jax.experimental import pallas as pl
from jax.experimental.pallas import tpu as pltpu


def _default_vmem_budget():
    """Per-step VMEM budget (bytes) by TPU generation."""
    try:
        kind = jax.devices()[0].device_kind.lower()
    except Exception:
        kind = ""
    if "v5" in kind or "v6" in kind:
        return 96 * 1024 * 1024       # 128 MiB physical VMEM: buy big blocks
    return 48 * 1024 * 1024           # v7x (64 MiB physical) & unknown: headroom


def _pick_d_slab(D, max_slab=1024):
    """Lane-dense slab width for chunking the gather's f32 output over D."""
    if D <= max_slab or D % 128 != 0:
        return D
    best = 128
    for c in range(128, max_slab + 1, 128):
        if D % c == 0:
            best = c
    return best


def _pick_block_batches(B, S, footprint_fn, budget):
    """Largest divisor of B whose per-step footprint fits the budget, keeping
    the grid >= 2 blocks whenever B >= 2 (v7x dual-TC + DMA/compute overlap)."""
    cap = B if B < 2 else B // 2
    fitting = [d for d in range(1, cap + 1)
               if B % d == 0 and footprint_fn(d) <= budget]
    if not fitting:
        return 1
    # Prefer MXU-friendly row counts (multiple of 256), then the largest block.
    return max(fitting, key=lambda d: ((d * S) % 256 == 0, d))


def make_controller_layer2(input_dim, output_dim, *, alpha=0.01, k=1,
                           temperature=1.0, vmem_budget_bytes=None):
    use_temperature = (temperature != 1.0)
    inv_temp = 1.0 / float(temperature)

    def call(x, w):
        B, S, D = x.shape
        O = w.shape[0]
        assert D == input_dim and O == output_dim
        if O > S:
            raise ValueError(
                "ControllerLayer2 gathers sequence rows with expert indices; "
                f"requires output_dim ({O}) <= seq ({S}).")
        if not (1 <= k <= O):
            raise ValueError(f"k ({k}) must be in [1, output_dim ({O})].")
        if w.dtype != x.dtype:
            # Keep both MXU operands in the input's native dtype (fast MXU path,
            # half the bytes). NOTE: with bf16 activations this downcasts f32
            # router weights; decisions near exact ties may differ from an f32
            # logits computation.
            w = w.astype(x.dtype)
        wt = w.T                               # (D, O): feed the MXU a (K, N) operand
        itemsize = jnp.dtype(x.dtype).itemsize

        budget = int(vmem_budget_bytes or _default_vmem_budget())
        d_slab = _pick_d_slab(D)
        n_slabs = D // d_slab

        def footprint(bt):
            rows = bt * S
            fp = 2 * rows * D * itemsize       # x input, double-buffered
            fp += 2 * rows * D * itemsize      # y output, double-buffered
            fp += 2 * D * O * itemsize         # weight tile (counted dbl-buf)
            fp += 7 * rows * O * 4             # (rows,O) f32/i32 temps: logits, e,
                                               #   probs, work, w_sel, iota, masks
            fp += rows * O * itemsize          # w_sel cast to native dtype
            fp += rows * d_slab * 4            # f32 gather-output slab
            fp += bt * O * d_slab * itemsize   # x_top slab slice
            return fp

        bt = _pick_block_batches(B, S, footprint, budget)
        nb = B // bt
        rows = bt * S
        n_tokens = float(B * S)

        fp = footprint(bt)
        vmem_limit = None
        if fp > 12 * 1024 * 1024:              # v5e's default scoped limit is 16 MiB
            vmem_limit = min(max((fp * 5) // 4, 32 * 1024 * 1024),
                             128 * 1024 * 1024)
        # TODO(synk): if footprint(1) still exceeds the budget (huge S*D), the
        # sequence dim would also have to be tiled (separate x BlockSpec feeding
        # the first O rows to the gather); not implemented here.

        def kernel(x_ref, wt_ref, y_ref, psum_ref, cnt_ref):
            xb = x_ref[...]                    # (bt, S, D), native dtype

            # ---- logits on the MXU: native-dtype operands, f32 accumulate ----
            x_flat = xb.reshape(rows, D)       # leading-dim collapse (free)
            logits = jax.lax.dot_general(
                x_flat, wt_ref[...],
                dimension_numbers=(((1,), (0,)), ((), ())),
                preferred_element_type=jnp.float32)            # (rows, O)
            if use_temperature:
                logits = logits * jnp.float32(inv_temp)

            # ---- softmax statistics over experts ----
            m = jnp.max(logits, axis=-1, keepdims=True)        # (rows, 1)
            e = jnp.exp(logits - m)                            # (rows, O)
            denom = jnp.sum(e, axis=-1, keepdims=True)         # (rows, 1)
            # gates use the (free) EUP approximate reciprocal; the aux-loss
            # statistic uses an exact (rows,1) divide -> no approximation bias
            # in router_probs / aux_loss.
            inv_denom = pl.reciprocal(denom, approx=True)      # (rows, 1)
            psum_ref[...] = jnp.sum(e * (1.0 / denom), axis=0,
                                    keepdims=True).reshape(1, 1, O)

            # ---- iterative top-k on logits (same ordering as on probs) ----
            col_o = jax.lax.broadcasted_iota(jnp.int32, (rows, O), 1)
            neg_inf = jnp.float32(-jnp.inf)
            w_sel = jnp.zeros((rows, O), jnp.float32)          # gate-weighted one-hots
            work = logits
            for _ in range(k):                                  # static unroll; k small
                mval = jnp.max(work, axis=-1, keepdims=True)
                idx = jnp.min(jnp.where(work == mval, col_o, O),
                              axis=-1, keepdims=True)           # lowest index on ties
                sel = col_o == idx                               # (rows, O)
                # softmax prob of the selected expert, straight from its logit
                gate = jnp.exp(mval - m) * inv_denom             # (rows, 1)
                w_sel = w_sel + jnp.where(sel, gate, 0.0)
                work = jnp.where(sel, neg_inf, work)
            # selected positions are exactly those knocked out to -inf
            cnt_ref[...] = jnp.sum((work == neg_inf).astype(jnp.float32),
                                   axis=0, keepdims=True).reshape(1, 1, O)

            # ---- gather: ONE batched (S,O)@(O,d_slab) matmul per batch elt ----
            # Expert indices are always < O <= S, so only the first O sequence
            # rows of each batch element can be selected. Both operands stay in
            # the native dtype (f32 accumulate); the f32 output is chunked over
            # D in lane-dense slabs to bound live VMEM.
            w_sel_n = w_sel.reshape(bt, S, O).astype(xb.dtype)
            for sl in range(n_slabs):
                lo = sl * d_slab
                x_top = xb[:, :O, lo:lo + d_slab]               # (bt, O, d_slab)
                y3 = jax.lax.dot_general(
                    w_sel_n, x_top,
                    dimension_numbers=(((2,), (1,)), ((0,), (0,))),
                    preferred_element_type=jnp.float32)          # (bt, S, d_slab)
                # NOTE: dense unmasked store when d_slab % 128 == 0.
                y_ref[:, :, lo:lo + d_slab] = y3.astype(y_ref.dtype)

        y, psum, cnt = pl.pallas_call(
            kernel,
            out_shape=(jax.ShapeDtypeStruct((B, S, D), x.dtype),
                       jax.ShapeDtypeStruct((nb, 1, O), jnp.float32),
                       jax.ShapeDtypeStruct((nb, 1, O), jnp.float32)),
            grid_spec=pltpu.PrefetchScalarGridSpec(
                num_scalar_prefetch=0,
                grid=(nb,),
                in_specs=[pl.BlockSpec((bt, S, D), lambda b: (b, 0, 0)),
                          pl.BlockSpec((D, O), lambda b: (0, 0))],
                out_specs=(pl.BlockSpec((bt, S, D), lambda b: (b, 0, 0)),
                           pl.BlockSpec((1, 1, O), lambda b: (b, 0, 0)),
                           pl.BlockSpec((1, 1, O), lambda b: (b, 0, 0)))),
            compiler_params=pltpu.CompilerParams(
                dimension_semantics=("parallel",),      # blocks fully independent
                vmem_limit_bytes=vmem_limit),
        )(x, wt)

        # Tiny epilogue reduction in plain JAX (keeps the grid axis parallel).
        router_probs = psum.sum(axis=(0, 1)) / jnp.float32(n_tokens)   # (O,)
        counts = cnt.sum(axis=(0, 1))                                   # (O,)
        frac = counts / counts.sum()
        aux = jnp.float32(alpha * output_dim) * jnp.sum(router_probs * frac)
        # TODO(synk): return_moe_metrics (topk_probs / topk_idx outputs) is not
        # emitted; only the default forward outputs (y, aux_loss) are produced.
        return {"y": y, "aux_loss": aux}

    return call


if __name__ == "__main__":
    B, S, D, O = 4, 16, 32, 16          # batch, seq, input_dim, output_dim (O <= S)
    k, alpha, temperature = 2, 0.01, 1.0

    key = jax.random.PRNGKey(0)
    kx, kw = jax.random.split(key)
    x = jax.random.normal(kx, (B, S, D), dtype=jnp.float32)
    bound = 1.0 / math.sqrt(D)          # nn.Linear default init range
    w = jax.random.uniform(kw, (O, D), dtype=jnp.float32, minval=-bound, maxval=bound)

    # nb >= 2 is forced by the block picker -> 2 batch elements per grid step,
    # grid of 2 blocks, exercising the multi-block partial-sum reduction path.
    layer = jax.jit(make_controller_layer2(D, O, alpha=alpha, k=k,
                                           temperature=temperature))
    out = layer(x, w)
    jax.block_until_ready(out)

    # pure-JAX reference (mirrors the PyTorch forward exactly)
    logits = jnp.einsum("bsd,od->bso", x, w)
    if temperature != 1.0:
        logits = logits / temperature
    probs = jax.nn.softmax(logits, axis=-1)
    topk_probs, topk_idx = jax.lax.top_k(probs, k)
    sel = x[jnp.arange(B)[:, None, None], topk_idx, :]        # (B, S, k, D)
    y_ref = (topk_probs[..., None] * sel).sum(-2)
    router_probs = probs.mean(axis=(0, 1))
    counts = jnp.zeros((O,), jnp.float32).at[topk_idx.reshape(-1)].add(1.0)
    frac = counts / counts.sum()
    aux_ref = alpha * O * (router_probs * frac).sum()

    # y tolerance covers the EUP approximate reciprocal used for the gates;
    # aux_loss uses an exact reciprocal in-kernel so it matches tightly.
    assert jnp.allclose(out["y"], y_ref, atol=5e-3, rtol=5e-3), (
        float(jnp.max(jnp.abs(out["y"] - y_ref))))
    assert jnp.allclose(out["aux_loss"], aux_ref, atol=1e-5, rtol=1e-4), (
        float(out["aux_loss"]), float(aux_ref))
    print("KERNEL_OK")
</pallas_src>

<mosaic_0001>
module attributes {stable_mosaic.version = 11 : i64} {
  func.func @kernel(%arg0: i32, %arg1: memref<2x16x32xf32, #tpu.memory_space<vmem>>, %arg2: memref<32x16xf32, #tpu.memory_space<vmem>>, %arg3: memref<2x16x32xf32, #tpu.memory_space<vmem>>, %arg4: memref<1x1x16xf32, #tpu.memory_space<vmem>>, %arg5: memref<1x1x16xf32, #tpu.memory_space<vmem>>) attributes {dimension_semantics = [#tpu.dimension_semantics<parallel>], iteration_bounds = array<i64: 2>, scalar_prefetch = 0 : i64, scratch_operands = 0 : i64, tpu.core_type = #tpu.core_type<tc>, window_params = [{transform_indices = @transform_0, window_bounds = array<i64: 2, 16, 32>}, {pipeline_mode = #tpu.pipeline_mode<synchronous>, transform_indices = @transform_1, window_bounds = array<i64: 32, 16>}, {transform_indices = @transform_2, window_bounds = array<i64: 2, 16, 32>}, {transform_indices = @transform_3, window_bounds = array<i64: 1, 1, 16>}, {transform_indices = @transform_4, window_bounds = array<i64: 1, 1, 16>}]} {
    %c0 = arith.constant 0 : index
    %c0_0 = arith.constant 0 : index
    %c0_1 = arith.constant 0 : index
    %0 = vector.load %arg1[%c0, %c0_0, %c0_1] : memref<2x16x32xf32, #tpu.memory_space<vmem>>, vector<2x16x32xf32>
    %1 = vector.shape_cast %0 : vector<2x16x32xf32> to vector<32x32xf32>
    %c0_2 = arith.constant 0 : index
    %c0_3 = arith.constant 0 : index
    %2 = vector.load %arg2[%c0_2, %c0_3] : memref<32x16xf32, #tpu.memory_space<vmem>>, vector<32x16xf32>
    %cst = arith.constant dense<0.000000e+00> : vector<32x16xf32>
    %3 = tpu.matmul %1, %2, %cst {dimension_numbers = #tpu.dot_dimension_numbers<[1], [0], [0], [1], [0, 0, 1, 1], [], []>} : vector<32x32xf32>, vector<32x16xf32>, vector<32x16xf32> -> vector<32x16xf32>
    %cst_4 = arith.constant dense<0xFF800000> : vector<32xf32>
    %4 = vector.multi_reduction <maximumf>, %3, %cst_4 [1] : vector<32x16xf32> to vector<32xf32>
    %5 = vector.shape_cast %4 : vector<32xf32> to vector<32x1xf32>
    %6 = vector.broadcast %5 : vector<32x1xf32> to vector<32x16xf32>
    %7 = arith.subf %3, %6 : vector<32x16xf32>
    %8 = math.exp %7 : vector<32x16xf32>
    %cst_5 = arith.constant dense<0.000000e+00> : vector<32xf32>
    %9 = vector.multi_reduction <add>, %8, %cst_5 [1] : vector<32x16xf32> to vector<32xf32>
    %10 = vector.shape_cast %9 : vector<32xf32> to vector<32x1xf32>
    %11 = tpu.reciprocal %10 {approx = true} : vector<32x1xf32> -> vector<32x1xf32>
    %cst_6 = arith.constant 1.000000e+00 : f32
    %12 = vector.broadcast %cst_6 : f32 to vector<32x1xf32>
    %13 = arith.divf %12, %10 : vector<32x1xf32>
    %14 = vector.broadcast %13 : vector<32x1xf32> to vector<32x16xf32>
    %15 = arith.mulf %8, %14 : vector<32x16xf32>
    %cst_7 = arith.constant dense<0.000000e+00> : vector<16xf32>
    %16 = vector.multi_reduction <add>, %15, %cst_7 [0] : vector<32x16xf32> to vector<16xf32>
    %17 = vector.shape_cast %16 : vector<16xf32> to vector<1x16xf32>
    %18 = vector.shape_cast %17 : vector<1x16xf32> to vector<1x1x16xf32>
    %c0_8 = arith.constant 0 : index
    %c0_9 = arith.constant 0 : index
    %c0_10 = arith.constant 0 : index
    %19 = vector.load %arg4[%c0_8, %c0_9, %c0_10] : memref<1x1x16xf32, #tpu.memory_space<vmem>>, vector<1x1x16xf32>
    tpu.vector_store %arg4[%c0_8, %c0_9, %c0_10], %18 {strides = array<i32>} : memref<1x1x16xf32, #tpu.memory_space<vmem>>, vector<1x1x16xf32>,
    %20 = tpu.iota {dimensions = array<i32: 1>} : vector<32x16xi32>
    %cst_11 = arith.constant 0.000000e+00 : f32
    %21 = vector.broadcast %cst_11 : f32 to vector<32x16xf32>
    %cst_12 = arith.constant dense<0xFF800000> : vector<32xf32>
    %22 = vector.multi_reduction <maximumf>, %3, %cst_12 [1] : vector<32x16xf32> to vector<32xf32>
    %23 = vector.shape_cast %22 : vector<32xf32> to vector<32x1xf32>
    %24 = vector.broadcast %23 : vector<32x1xf32> to vector<32x16xf32>
    %25 = arith.cmpf oeq, %3, %24 : vector<32x16xf32>
    %c16_i32 = arith.constant 16 : i32
    %26 = vector.broadcast %c16_i32 : i32 to vector<32x16xi32>
    %27 = arith.select %25, %20, %26 : vector<32x16xi1>, vector<32x16xi32>
    %cst_13 = arith.constant dense<2147483647> : vector<32xi32>
    %28 = vector.multi_reduction <minsi>, %27, %cst_13 [1] : vector<32x16xi32> to vector<32xi32>
    %29 = vector.shape_cast %28 : vector<32xi32> to vector<32x1xi32>
    %30 = vector.broadcast %29 : vector<32x1xi32> to vector<32x16xi32>
    %31 = arith.cmpi eq, %20, %30 : vector<32x16xi32>
    %32 = arith.subf %23, %5 : vector<32x1xf32>
    %33 = math.exp %32 : vector<32x1xf32>
    %34 = arith.mulf %33, %11 : vector<32x1xf32>
    %cst_14 = arith.constant 0.000000e+00 : f32
    %35 = vector.shape_cast %34 : vector<32x1xf32> to vector<32x1xf32>
    %36 = vector.broadcast %35 : vector<32x1xf32> to vector<32x16xf32>
    %37 = vector.broadcast %cst_14 : f32 to vector<32x16xf32>
    %38 = arith.select %31, %36, %37 : vector<32x16xi1>, vector<32x16xf32>
    %39 = arith.addf %21, %38 : vector<32x16xf32>
    %cst_15 = arith.constant 0xFF800000 : f32
    %40 = vector.broadcast %cst_15 : f32 to vector<32x16xf32>
    %41 = arith.select %31, %40, %3 : vector<32x16xi1>, vector<32x16xf32>
    %cst_16 = arith.constant dense<0xFF800000> : vector<32xf32>
    %42 = vector.multi_reduction <maximumf>, %41, %cst_16 [1] : vector<32x16xf32> to vector<32xf32>
    %43 = vector.shape_cast %42 : vector<32xf32> to vector<32x1xf32>
    %44 = vector.broadcast %43 : vector<32x1xf32> to vector<32x16xf32>
    %45 = arith.cmpf oeq, %41, %44 : vector<32x16xf32>
    %c16_i32_17 = arith.constant 16 : i32
    %46 = vector.broadcast %c16_i32_17 : i32 to vector<32x16xi32>
    %47 = arith.select %45, %20, %46 : vector<32x16xi1>, vector<32x16xi32>
    %cst_18 = arith.constant dense<2147483647> : vector<32xi32>
    %48 = vector.multi_reduction <minsi>, %47, %cst_18 [1] : vector<32x16xi32> to vector<32xi32>
    %49 = vector.shape_cast %48 : vector<32xi32> to vector<32x1xi32>
    %50 = vector.broadcast %49 : vector<32x1xi32> to vector<32x16xi32>
    %51 = arith.cmpi eq, %20, %50 : vector<32x16xi32>
    %52 = arith.subf %43, %5 : vector<32x1xf32>
    %53 = math.exp %52 : vector<32x1xf32>
    %54 = arith.mulf %53, %11 : vector<32x1xf32>
    %cst_19 = arith.constant 0.000000e+00 : f32
    %55 = vector.shape_cast %54 : vector<32x1xf32> to vector<32x1xf32>
    %56 = vector.broadcast %55 : vector<32x1xf32> to vector<32x16xf32>
    %57 = vector.broadcast %cst_19 : f32 to vector<32x16xf32>
    %58 = arith.select %51, %56, %57 : vector<32x16xi1>, vector<32x16xf32>
    %59 = arith.addf %39, %58 : vector<32x16xf32>
    %cst_20 = arith.constant 0xFF800000 : f32
    %60 = vector.broadcast %cst_20 : f32 to vector<32x16xf32>
    %61 = arith.select %51, %60, %41 : vector<32x16xi1>, vector<32x16xf32>
    %cst_21 = arith.constant 0xFF800000 : f32
    %62 = vector.broadcast %cst_21 : f32 to vector<32x16xf32>
    %63 = arith.cmpf oeq, %61, %62 : vector<32x16xf32>
    %64 = arith.extui %63 : vector<32x16xi1> to vector<32x16xi32>
    %65 = arith.sitofp %64 : vector<32x16xi32> to vector<32x16xf32>
    %cst_22 = arith.constant dense<0.000000e+00> : vector<16xf32>
    %66 = vector.multi_reduction <add>, %65, %cst_22 [0] : vector<32x16xf32> to vector<16xf32>
    %67 = vector.shape_cast %66 : vector<16xf32> to vector<1x16xf32>
    %68 = vector.shape_cast %67 : vector<1x16xf32> to vector<1x1x16xf32>
    %c0_23 = arith.constant 0 : index
    %c0_24 = arith.constant 0 : index
    %c0_25 = arith.constant 0 : index
    %69 = vector.load %arg5[%c0_23, %c0_24, %c0_25] : memref<1x1x16xf32, #tpu.memory_space<vmem>>, vector<1x1x16xf32>
    tpu.vector_store %arg5[%c0_23, %c0_24, %c0_25], %68 {strides = array<i32>} : memref<1x1x16xf32, #tpu.memory_space<vmem>>, vector<1x1x16xf32>,
    %70 = vector.shape_cast %59 : vector<32x16xf32> to vector<2x16x16xf32>
    %cst_26 = arith.constant dense<0.000000e+00> : vector<2x16x32xf32>
    %71 = tpu.matmul %70, %0, %cst_26 {dimension_numbers = #tpu.dot_dimension_numbers<[2], [1], [1], [2], [0, 0, 0, 1, 1, 2], [0], [0]>} : vector<2x16x16xf32>, vector<2x16x32xf32>, vector<2x16x32xf32> -> vector<2x16x32xf32>
    %c0_27 = arith.constant 0 : index
    %c0_28 = arith.constant 0 : index
    %c0_29 = arith.constant 0 : index
    %72 = vector.load %arg3[%c0_27, %c0_28, %c0_29] : memref<2x16x32xf32, #tpu.memory_space<vmem>>, vector<2x16x32xf32>
    tpu.vector_store %arg3[%c0_27, %c0_28, %c0_29], %71 {strides = array<i32>} : memref<2x16x32xf32, #tpu.memory_space<vmem>>, vector<2x16x32xf32>,
    return
  }
  func.func @transform_0(%arg0: i32) -> (i32, i32, i32) {
    %c0_i32 = arith.constant 0 : i32
    %c0_i32_0 = arith.constant 0 : i32
    %c0_i32_1 = arith.constant 0 : i32
    return %arg0, %c0_i32, %c0_i32_0 : i32, i32, i32
  }
  func.func @transform_1(%arg0: i32) -> (i32, i32) {
    %c0_i32 = arith.constant 0 : i32
    %c0_i32_0 = arith.constant 0 : i32
    %c0_i32_1 = arith.constant 0 : i32
    return %c0_i32, %c0_i32_0 : i32, i32
  }
  func.func @transform_2(%arg0: i32) -> (i32, i32, i32) {
    %c0_i32 = arith.constant 0 : i32
    %c0_i32_0 = arith.constant 0 : i32
    %c0_i32_1 = arith.constant 0 : i32
    return %arg0, %c0_i32, %c0_i32_0 : i32, i32, i32
  }
  func.func @transform_3(%arg0: i32) -> (i32, i32, i32) {
    %c0_i32 = arith.constant 0 : i32
    %c0_i32_0 = arith.constant 0 : i32
    %c0_i32_1 = arith.constant 0 : i32
    return %arg0, %c0_i32, %c0_i32_0 : i32, i32, i32
  }
  func.func @transform_4(%arg0: i32) -> (i32, i32, i32) {
    %c0_i32 = arith.constant 0 : i32
    %c0_i32_0 = arith.constant 0 : i32
    %c0_i32_1 = arith.constant 0 : i32
    return %arg0, %c0_i32, %c0_i32_0 : i32, i32, i32
  }
}

</mosaic_0001>

<bundles_post_ra>
// kernel: call.1
= control target key start
LH: loop header
LB: loop body
LE: loop exit
PB: predicated region body
PF: predicated region fallthrough
CT: control target
= control target key end

     0   :  { %10 = vsyncpa [#allocation3], 0  ;;  %s1533_s0 = inlined_call_operand.hbm [shape: f32[4,16,32], index: 0, kind: input, shape index: {}]   ;;  %s1534_s1 = inlined_call_operand.vmem [shape: f32[32,16], index: 1, kind: input, shape index: {}]   ;;  %s1535_s2 = inlined_call_operand.hbm [shape: f32[4,16,32], index: 2, kind: output, shape index: {0}]   ;;  %s1536_s3 = inlined_call_operand.vmem [shape: f32[2,1,16], index: 3, kind: output, shape index: {1}]   ;;  %s1537_s4 = inlined_call_operand.vmem [shape: f32[2,1,16], index: 4, kind: output, shape index: {2}]  }
   0x1   :  { %12 = vsyncpa [#allocation3 + $0x1], 0 }
   0x2   :  { %13 = vsyncpa [#allocation4], 0 }
   0x3   :  { %15 = vsyncpa [#allocation4 + $0x1], 0  ;;  %s1097_s15 = smov 0   ;;  %s1099_s16 = smov 0  }
   0x4   :  { %s1101_s17 = smov 0   ;;  %s1103_s18 = smov 0  }
   0x5 LB: > { %s1118_s19 = sadd.s32 4294967295, %s1065_s18   ;;  %s850_s20 = sadd.s32 4294967294, %s1065_s18   ;;  %s1065_s18 = sphi %s1103_s18, %s1553_s18   ;;  %s1061_s17 = sphi %s1101_s17, %s1552_s17   ;;  %s1057_s16 = sphi %s1099_s16, %s1551_s16   ;;  %s1053_s15 = sphi %s1097_s15, %s1550_s15  }
   0x6   : > { %s1122_s21 = sadd.s32 1, %s1065_s18   ;;  %s28_s22 = sadd.s32 1, %s1061_s17 }
   0x7   : > { %s25_s23 = ssub.s32 %s1065_s18, %s1122_s21  ;;  %p35_p0 = scmp.ne.s32.totalorder %s1061_s17, %s1057_s16 }
   0x8   : > { %p26_p1 = scmp.eq.s32.totalorder %s25_s23, 0  ;;  %p36_p2 = scmp.eq.s32.totalorder %s1065_s18, 0 }
   0x9   : > { %p41_p3 = scmp.ne.s32.totalorder %s1057_s16, %s1053_s15  ;;  %p42_p4 = scmp.eq.s32.totalorder %s1118_s19, 0 }
   0xa   : > { %s1134_s24 = scalar_select %p26_p1, %s1061_s17, %s28_s22  }
   0xb   : > { %p1136_p5 = por %p36_p2, %p35_p0  ;;  %p1140_p6 = por %p42_p4, %p41_p3 }
   0xc   : > { %p86_p7 = scmp.eq.s32.totalorder %s1118_s19, 1  ;;  %p92_p8 = scmp.eq.s32.totalorder %s850_s20, 1 }
   0xd   : > { %p898_p10 = scmp.lt.s32.totalorder %s1065_s18, 2  ;;  %s167_s29 = sand.u32 1, %s1061_s17  }
   0xe   : > { %p1147_p11 = por %p86_p7, %p35_p0  ;;  %p1151_p12 = por %p92_p8, %p41_p3 }
   0xf   : > { %s879_s30 = sshll.u32 %s1065_s18, 5  ;;  %s853_s5 = sshll.u32 %s167_s29, 5 }
  0x10   : > { %s177_s8 = scalar_lea.hbm %s1533_s0, %s879_s30  ;;  %s171_s10 = scalar_lea.vmem [#allocation2], %s853_s5 }
  0x11   : > { %s178_s9 = sshll.u32 %s177_s8, 4  ;;  %s180_s11 = sshll.u32 %s171_s10, 4  ;;  %s179_s9 = int_to_ptr.hbm [resolvable:$true] %s178_s9  ;;  %s181_s11 = int_to_ptr.vmem [resolvable:$true] %s180_s11 }
  0x12   : > { %p1162_p13 = pnand %p898_p10, %p1136_p5  ;;  %p857_p0 = scmp.ge.s32.totalorder %s1065_s18, 1 }
  0x13   : > { %p188_p1 = scmp.lt.s32.totalorder %s1065_s18, 3  ;;  %s168_s13 = scalar_lea.sflag [#allocation3], %s167_s29 }
  0x14   : > { %s969_s14 = sshra.s32 %s179_s9, 4  ;;  %p973_p3 = pneg %p1162_p13  ;;  %s970_s14 = int_to_ptr.hbm [resolvable:$true] %s969_s14 }
  0x15   : > { %s971_s20 = scalar_lea.hbm %s970_s14, 32  ;;  %s976_s25 = scalar_lea.hbm %s1533_s0, 64 }
  0x16   : > { %p972_p2 = scmp.ne.s32.totalorder %s970_s14, %s971_s20  ;;  %p977_p5 = scmp.lt.s32.totalorder %s970_s14, %s1533_s0 }
  0x17   : > { %p978_p8 = scmp.lt.s32.totalorder %s976_s25, %s971_s20 }
  0x18   : > { %p974_p4 = pnand %p973_p3, %p972_p2 }
  0x19   : > { %p979_p10 = por %p978_p8, %p977_p5 }
  0x1a   : > { %p975_p7 = pneg %p974_p4 }
  0x1c   : > { %p980_p9 = pnand %p979_p10, %p975_p7 }
  0x1e   : > { %983 = shalt.err (!%p980_p9)
}
  0x1f   : > { %s1067_s29 = smov 128   ;;  %s1068_s6 = smov 8  }
  0x20   : > { %893 = dma.hbm_to_vmem [thread:$0]  (!%p1162_p13), %s179_s9, 512, %s181_s11, %s168_s13, %s1067_s29, %s1067_s29, %s1068_s6  }
  0x21   : > { %p189_p2 = pnand %p857_p0, %p188_p1 }
  0x22   : > { %s1183_s7 = sand.u32 (!%p189_p2), 1, %s1057_s16  }
  0x23   : > { %192 = sbr.rel (%p189_p2) target bundleno = 1057 (0x421), region = 28  ;;  %s858_s8 = sshll.u32 (!%p189_p2), %s1183_s7, 5 }
  0x24   : > { %s195_s10 = scalar_lea.sflag (!%p189_p2), [#allocation3], %s1183_s7  ;;  %s198_s14 = scalar_lea.vmem (!%p189_p2), [#allocation2], %s858_s8 }
  0x28   : > { %1044 = dma.done.wait (%p1140_p6), %s195_s10, 512  }
  0x29   : > { %1046 = vsyncadd (%p1140_p6), %s195_s10, 4294966784  ;;  %v245_v0 = vld [vmem:[%s1534_s1 + $0x18] sm:$0xff]  ;;  %v244_v1 = vld [vmem:[%s1534_s1 + $0x10] sm:$0xff]  ;;  %vm246_vm0 = vcmask 261120   ;;  %vm288_vm1 = vcmask 130048   ;;  %v408_v16 = vlaneseq  ;;  %p232_p6 = scmp.lt.s32.totalorder %s1118_s19, 1 }
  0x2a   : > { %882 = vmatpush.msra.mxu3 %v245_v0  ;;  %271 = vmatpush.msra.mxu0 %v245_v0  ;;  %v241_v2 = vld [vmem:[%s198_s14 + $0x18] sm:$0xff]  ;;  %v243_v3 = vld [vmem:[%s1534_s1 + $0x8] sm:$0xff]  ;;  %v240_v4 = vld [vmem:[%s198_s14 + $0x10] sm:$0xff]  ;;  %s219_s9 = scalar_lea.vmem [#allocation5], %s858_s8  ;;  %s881_s11 = sshll.u32 %s1118_s19, 5 }
  0x2b   : > { %697 = vmatpush.msra.mxu2 %v241_v2  ;;  %v239_v5 = vld [vmem:[%s198_s14 + $0x8] sm:$0xff]  ;;  %v242_v6 = vld [vmem:[%s1534_s1] sm:$0xff]  ;;  %v1225_v17 = vand.u32 127, %v408_v16  ;;  %s1420_s25 = scalar_select %p232_p6, %s1118_s19, 1 }
  0x2c   : > { %883 = vmatpush.msra.mxu3 %v244_v1  ;;  %272 = vmatpush.msra.mxu0 %v244_v1  ;;  %v238_v7 = vld [vmem:[%s198_s14] sm:$0xff]  ;;  %s729_s20 = scalar_lea.hbm %s1535_s2, %s881_s11  ;;  %s730_s22 = sshll.u32 %s219_s9, 4  ;;  %s731_s22 = int_to_ptr.vmem [resolvable:$true] %s730_s22 }
  0x2d   : > { %698 = vmatpush.msra.mxu2 %v240_v4  ;;  %668 = vmatpush.msra.mxu1 %v239_v5  ;;  %s234_s29 = scalar_lea.vmem %s1536_s3, %s1420_s25  ;;  %s237_s14 = scalar_lea.vmem %s1537_s4, %s1420_s25 }
  0x2e   : > { %884 = vmatpush.msra.mxu3 %v243_v3  ;;  %273 = vmatpush.msra.mxu0 %v243_v3  ;;  %s732_s26 = sshll.u32 %s729_s20, 4  ;;  %s711_s8 = scalar_lea.sflag [#allocation4], %s1183_s7  ;;  %s733_s26 = int_to_ptr.hbm [resolvable:$true] %s732_s26 }
  0x2f   : > { %669 = vmatpush.msra.mxu1 %v238_v7  ;;  %s1013_s19 = sshra.s32 %s733_s26, 4  ;;  %s1019_s5 = scalar_lea.hbm %s1535_s2, 64  ;;  %s1014_s19 = int_to_ptr.hbm [resolvable:$true] %s1013_s19 }
  0x30   : > { %885 = vmatpush.msra.mxu3 %v242_v6  ;;  %274 = vmatpush.msra.mxu0 %v242_v6  ;;  %s1015_s23 = scalar_lea.hbm %s1014_s19, 32  ;;  %p1020_p1 = scmp.lt.s32.totalorder %s1014_s19, %s1535_s2 }
  0x31   : > { %862 = vmatmul.msk.f32.vlgmr.msra.gmra.mxu3 %vm246_vm0, %v240_v4  ;;  %860 = vmatmul.msk.f32.vlgmr.msra.gmra.mxu0 %vm246_vm0, %v238_v7  ;;  %p1016_p9 = scmp.ne.s32.totalorder %s1014_s19, %s1015_s23  ;;  %p1021_p3 = scmp.lt.s32.totalorder %s1019_s5, %s1015_s23 }
  0x33   : > { %p1017_p13 = pnand %p1016_p9, %p1147_p11  ;;  %p1022_p4 = por %p1021_p3, %p1020_p1 }
  0x35   : > { %p1018_p0 = pneg %p1017_p13 }
  0x37   : > { %p1023_p7 = pnand %p1022_p4, %p1018_p0 }
  0x39   : > { %863 = vmatmul.msk.f32.gmra.mxu3 %vm246_vm0, %v241_v2  ;;  %861 = vmatmul.msk.f32.gmra.mxu0 %vm246_vm0, %v239_v5 }
  0xae   : > { %v1213_v10 = vpop.f32.mrf.mxu0 }
  0xaf   : > { %v289_v11 = vsel %vm288_vm1, %v1213_v10, -inf }
  0xb4   : > { %v1209_v8 = vpop.f32.mrf.mxu3 }
  0xb5   : > { %v295_v9 = vsel %vm288_vm1, %v1209_v8, -inf }
  0xb6   : > { %296 = vmax.xlane.f32.xlu0 %v295_v9  ;;  %v1221_v14 = vpop.f32.mrf.mxu0 }
  0xb7   : > { %v292_v15 = vsel %vm288_vm1, %v1221_v14, -inf }
  0xbc   : > { %v1217_v12 = vpop.f32.mrf.mxu3 }
  0xbd   : > { %v298_v13 = vsel %vm288_vm1, %v1217_v12, -inf }
  0xbe   : > { %299 = vmax.xlane.f32.xlu1 %v298_v13  ;;  %290 = vmax.xlane.f32.xlu0 %v289_v11 }
  0xc6   : > { %293 = vmax.xlane.f32.xlu1 %v292_v15 }
 0x129   : > { %v1227_v18 = vpop.xlane.xlu0 %296 }
 0x12a   : > { %vm412_vm2 = vcmp.eq.f32.partialorder %v1209_v8, %v1227_v18 }
 0x12b   : > { %v416_v19 = vsel %vm412_vm2, %v1225_v17, 16 }
 0x12c   : > { %v448_v20 = vsel %vm288_vm1, %v416_v19, 2147483647 }
 0x12d   : > { %v450_v21 = vshra.s32 %v448_v20, 16  ;;  %v449_v38 = vand.u32 65535, %v448_v20 }
 0x12f   : > { %v452_v22 = vcvt.s32.f32 %v450_v21  ;;  %v451_v40 = vcvt.s32.f32 %v449_v38 }
 0x131   : > { %453 = vmin.xlane.f32.xlu2 %v452_v22  ;;  %v1233_v23 = vpop.xlane.xlu1 %299  ;;  %v1235_v24 = vpop.xlane.xlu0 %290 }
 0x132   : > { %vm413_vm3 = vcmp.eq.f32.partialorder %v1217_v12, %v1233_v23  ;;  %vm410_vm4 = vcmp.eq.f32.partialorder %v1213_v10, %v1235_v24 }
 0x133   : > { %v417_v25 = vsel %vm413_vm3, %v1225_v17, 16  ;;  %v414_v26 = vsel %vm410_vm4, %v1225_v17, 16 }
 0x134   : > { %v463_v27 = vsel %vm288_vm1, %v417_v25, 2147483647  ;;  %v418_v28 = vsel %vm288_vm1, %v414_v26, 2147483647 }
 0x135   : > { %v465_v29 = vshra.s32 %v463_v27, 16  ;;  %v420_v30 = vshra.s32 %v418_v28, 16  ;;  %v419_v42 = vand.u32 65535, %v418_v28  ;;  %v464_v43 = vand.u32 65535, %v463_v27 }
 0x137   : > { %v467_v31 = vcvt.s32.f32 %v465_v29  ;;  %v422_v32 = vcvt.s32.f32 %v420_v30  ;;  %v421_v46 = vcvt.s32.f32 %v419_v42  ;;  %v466_v47 = vcvt.s32.f32 %v464_v43 }
 0x138   : > { %v304_v42 = vsub.f32 %v1217_v12, %v1233_v23 }
 0x139   : > { %v1245_v33 = vpop.xlane.xlu1 %293  ;;  %468 = vmin.xlane.f32.xlu0 %v467_v31  ;;  %423 = vmin.xlane.f32.xlu2 %v422_v32 }
 0x13a   : > { %vm411_vm5 = vcmp.eq.f32.partialorder %v1221_v14, %v1245_v33 }
 0x13b   : > { %v415_v34 = vsel %vm411_vm5, %v1225_v17, 16 }
 0x13c   : > { %v433_v35 = vsel %vm288_vm1, %v415_v34, 2147483647 }
 0x13d   : > { %v435_v36 = vshra.s32 %v433_v35, 16  ;;  %v434_v50 = vand.u32 65535, %v433_v35 }
 0x13f   : > { %v437_v37 = vcvt.s32.f32 %v435_v36  ;;  %v436_v52 = vcvt.s32.f32 %v434_v50 }
 0x141   : > { %438 = vmin.xlane.f32.xlu1 %v437_v37 }
 0x1a4   : > { %v454_v39 = vpop.xlane.xlu2 %453 }
 0x1a5   : > { %vm455_vm6 = vcmp.eq.f32.partialorder %v452_v22, %v454_v39  ;;  %v460_v54 = vcvt.f32.s32 %v454_v39 }
 0x1a6   : > { %v456_v41 = vsel %vm455_vm6, %v451_v40, inf }
 0x1a7   : > { %457 = vmin.xlane.f32.xlu2 %v456_v41  ;;  %v461_v56 = vshll.u32 %v460_v54, 16 }
 0x1ac   : > { %v424_v44 = vpop.xlane.xlu2 %423  ;;  %v469_v45 = vpop.xlane.xlu0 %468 }
 0x1ad   : > { %vm425_vm7 = vcmp.eq.f32.partialorder %v422_v32, %v424_v44  ;;  %vm470_vm8 = vcmp.eq.f32.partialorder %v467_v31, %v469_v45  ;;  %v430_v60 = vcvt.f32.s32 %v424_v44  ;;  %v475_v61 = vcvt.f32.s32 %v469_v45 }
 0x1ae   : > { %v426_v48 = vsel %vm425_vm7, %v421_v46, inf  ;;  %v471_v49 = vsel %vm470_vm8, %v466_v47, inf  ;;  %v303_v31 = vsub.f32 %v1209_v8, %v1227_v18 }
 0x1af   : > { %427 = vmin.xlane.f32.xlu0 %v426_v48  ;;  %472 = vmin.xlane.f32.xlu1 %v471_v49  ;;  %v431_v1 = vshll.u32 %v430_v60, 16  ;;  %v476_v2 = vshll.u32 %v475_v61, 16  ;;  %v311_v48 = vmul.f32 1.442695, %v304_v42 }
 0x1b0   : > { %v309_v35 = vmul.f32 1.442695, %v303_v31 }
 0x1b2   : > { %937 = vpow2.f32 %v309_v35 }
 0x1b4   : > { %v439_v51 = vpop.xlane.xlu1 %438 }
 0x1b5   : > { %vm440_vm9 = vcmp.eq.f32.partialorder %v437_v37, %v439_v51  ;;  %v445_v5 = vcvt.f32.s32 %v439_v51  ;;  %v302_v51 = vsub.f32 %v1221_v14, %v1245_v33 }
 0x1b6   : > { %v441_v53 = vsel %vm440_vm9, %v436_v52, inf }
 0x1b7   : > { %442 = vmin.xlane.f32.xlu2 %v441_v53  ;;  %v446_v15 = vshll.u32 %v445_v5, 16  ;;  %v307_v54 = vmul.f32 1.442695, %v302_v51 }
 0x1b8   : > { %v1329_v50 = vpop.eup %937 }
 0x1b9   : > { %v319_v52 = vsel %vm288_vm1, %v1329_v50, 0.0 }
 0x21a   : > { %v458_v55 = vpop.xlane.xlu2 %457 }
 0x21b   : > { %v459_v57 = vcvt.f32.s32 %v458_v55 }
 0x21d   : > { %v1251_v58 = vadd.s32 %v461_v56, %v459_v57 }
 0x21f   : > { %vm480_vm10 = vcmp.eq.s32.totalorder %v1225_v17, %v1251_v58 }
 0x220   : > { %v1259_v59 = vsel %vm480_vm10, -inf, %v1209_v8  ;;  %v301_v8 = vsub.f32 %v1213_v10, %v1235_v24 }
 0x221   : > { %v516_v62 = vsel %vm288_vm1, %v1259_v59, -inf }
 0x222   : > { %517 = vmax.xlane.f32.xlu0 %v516_v62  ;;  %v428_v63 = vpop.xlane.xlu0 %427  ;;  %v473_v0 = vpop.xlane.xlu1 %472  ;;  %v305_v46 = vmul.f32 1.442695, %v301_v8 }
 0x223   : > { %v429_v3 = vcvt.f32.s32 %v428_v63  ;;  %v474_v4 = vcvt.f32.s32 %v473_v0 }
 0x224   : > { %939 = vpow2.f32 %v305_v46 }
 0x225   : > { %v1263_v6 = vadd.s32 %v431_v1, %v429_v3  ;;  %v1265_v7 = vadd.s32 %v476_v2, %v474_v4  ;;  %941 = vpow2.f32 %v311_v48 }
 0x226   : > { %943 = vpow2.f32 %v307_v54 }
 0x227   : > { %vm478_vm11 = vcmp.eq.s32.totalorder %v1225_v17, %v1263_v6  ;;  %vm481_vm12 = vcmp.eq.s32.totalorder %v1225_v17, %v1265_v7 }
 0x228   : > { %v1275_v9 = vsel %vm478_vm11, -inf, %v1213_v10  ;;  %v1281_v11 = vsel %vm481_vm12, -inf, %v1217_v12 }
 0x229   : > { %v510_v16 = vsel %vm288_vm1, %v1275_v9, -inf  ;;  %v519_v19 = vsel %vm288_vm1, %v1281_v11, -inf }
 0x22a   : > { %v443_v13 = vpop.xlane.xlu2 %442  ;;  %511 = vmax.xlane.f32.xlu1 %v510_v16  ;;  %520 = vmax.xlane.f32.xlu2 %v519_v19  ;;  %v1335_v53 = vpop.eup %939 }
 0x22b   : > { %v444_v20 = vcvt.f32.s32 %v443_v13  ;;  %v1337_v55 = vpop.eup %941  ;;  %v313_v56 = vsel %vm288_vm1, %v1335_v53, 0.0 }
 0x22c   : > { %v322_v57 = vsel %vm288_vm1, %v1337_v55, 0.0 }
 0x22d   : > { %v1287_v21 = vadd.s32 %v446_v15, %v444_v20 }
 0x22f   : > { %vm479_vm13 = vcmp.eq.s32.totalorder %v1225_v17, %v1287_v21 }
 0x230   : > { %v1295_v22 = vsel %vm479_vm13, -inf, %v1221_v14  ;;  %v1343_v14 = vpop.eup %943 }
 0x231   : > { %v513_v25 = vsel %vm288_vm1, %v1295_v22, -inf  ;;  %v316_v60 = vsel %vm288_vm1, %v1343_v14, 0.0 }
 0x232   : > { %514 = vmax.xlane.f32.xlu0 %v513_v25 }
 0x295   : > { %v1299_v26 = vpop.xlane.xlu0 %517 }
 0x296   : > { %vm524_vm14 = vcmp.eq.f32.partialorder %v1259_v59, %v1299_v26  ;;  %v596_v3 = vsub.f32 %v1299_v26, %v1227_v18 }
 0x297   : > { %v528_v27 = vsel %vm524_vm14, %v1225_v17, 16 }
 0x298   : > { %v560_v28 = vsel %vm288_vm1, %v528_v27, 2147483647  ;;  %v602_v25 = vmul.f32 1.442695, %v596_v3 }
 0x299   : > { %v562_v29 = vshra.s32 %v560_v28, 16  ;;  %v561_v61 = vand.u32 65535, %v560_v28 }
 0x29a   : > { %945 = vpow2.f32 %v602_v25 }
 0x29b   : > { %v564_v30 = vcvt.s32.f32 %v562_v29  ;;  %v563_v63 = vcvt.s32.f32 %v561_v61 }
 0x29d   : > { %565 = vmin.xlane.f32.xlu1 %v564_v30  ;;  %v1307_v32 = vpop.xlane.xlu1 %511  ;;  %v1309_v34 = vpop.xlane.xlu2 %520 }
 0x29e   : > { %vm522_vm15 = vcmp.eq.f32.partialorder %v1275_v9, %v1307_v32  ;;  %vm525_vm2 = vcmp.eq.f32.partialorder %v1281_v11, %v1309_v34 }
 0x29f   : > { %v526_v36 = vsel %vm522_vm15, %v1225_v17, 16  ;;  %v529_v37 = vsel %vm525_vm2, %v1225_v17, 16 }
 0x2a0   : > { %v530_v38 = vsel %vm288_vm1, %v526_v36, 2147483647  ;;  %v575_v40 = vsel %vm288_vm1, %v529_v37, 2147483647 }
 0x2a1   : > { %v532_v39 = vshra.s32 %v530_v38, 16  ;;  %v577_v41 = vshra.s32 %v575_v40, 16  ;;  %v531_v1 = vand.u32 65535, %v530_v38  ;;  %v576_v2 = vand.u32 65535, %v575_v40 }
 0x2a3   : > { %v534_v43 = vcvt.s32.f32 %v532_v39  ;;  %v579_v45 = vcvt.s32.f32 %v577_v41  ;;  %v533_v5 = vcvt.s32.f32 %v531_v1  ;;  %v578_v15 = vcvt.s32.f32 %v576_v2 }
 0x2a5   : > { %v1323_v44 = vpop.xlane.xlu0 %514  ;;  %535 = vmin.xlane.f32.xlu2 %v534_v43  ;;  %580 = vmin.xlane.f32.xlu0 %v579_v45 }
 0x2a6   : > { %vm523_vm3 = vcmp.eq.f32.partialorder %v1295_v22, %v1323_v44 }
 0x2a7   : > { %v527_v47 = vsel %vm523_vm3, %v1225_v17, 16 }
 0x2a8   : > { %v545_v10 = vsel %vm288_vm1, %v527_v47, 2147483647 }
 0x2a9   : > { %v547_v49 = vshra.s32 %v545_v10, 16  ;;  %v546_v19 = vand.u32 65535, %v545_v10 }
 0x2ab   : > { %v549_v12 = vcvt.s32.f32 %v547_v49  ;;  %v548_v28 = vcvt.s32.f32 %v546_v19 }
 0x2ad   : > { %550 = vmin.xlane.f32.xlu1 %v549_v12  ;;  %320 = vadd.xlane.f32.xlu2 %v319_v52 }
 0x2b5   : > { %314 = vadd.xlane.f32.xlu1 %v313_v56  ;;  %323 = vadd.xlane.f32.xlu2 %v322_v57 }
 0x2bd   : > { %317 = vadd.xlane.f32.xlu2 %v316_v60 }
 0x310   : > { %v1347_v62 = vpop.xlane.xlu1 %565 }
 0x311   : > { %vm567_vm4 = vcmp.eq.f32.partialorder %v564_v30, %v1347_v62  ;;  %v946_v30 = vpop.eup %945 }
 0x312   : > { %v568_v0 = vsel %vm567_vm4, %v563_v63, inf  ;;  %v484_v63 = vsub.f32 %v1227_v18, %v1227_v18 }
 0x313   : > { %569 = vmin.xlane.f32.xlu0 %v568_v0 }
 0x318   : > { %v1352_v4 = vpop.xlane.xlu2 %535  ;;  %v1354_v13 = vpop.xlane.xlu0 %580 }
 0x319   : > { %vm537_vm5 = vcmp.eq.f32.partialorder %v534_v43, %v1352_v4  ;;  %vm582_vm6 = vcmp.eq.f32.partialorder %v579_v45, %v1354_v13 }
 0x31a   : > { %v538_v16 = vsel %vm537_vm5, %v533_v5, inf  ;;  %v583_v20 = vsel %vm582_vm6, %v578_v15, inf  ;;  %v594_v5 = vsub.f32 %v1307_v32, %v1235_v24  ;;  %v595_v32 = vsub.f32 %v1323_v44, %v1245_v33 }
 0x31b   : > { %539 = vmin.xlane.f32.xlu0 %v538_v16  ;;  %584 = vmin.xlane.f32.xlu1 %v583_v20 }
 0x320   : > { %v1358_v27 = vpop.xlane.xlu1 %550  ;;  %v321_v26 = vpop.xlane.xlu2 %320 }
 0x321   : > { %vm552_vm7 = vcmp.eq.f32.partialorder %v549_v12, %v1358_v27  ;;  %947 = vrcp.f32 %v321_v26  ;;  %vm364_vm9 = vweird.f32 %v321_v26  ;;  %v368_v57 = vand.u32 2147483647, %v321_v26 }
 0x322   : > { %v553_v29 = vsel %vm552_vm7, %v548_v28, inf  ;;  %v370_v60 = vand.u32 2147483648, %v321_v26 }
 0x323   : > { %554 = vmin.xlane.f32.xlu0 %v553_v29 }
 0x327   : > { %v1361_v35 = vpop.eup %947 }
 0x328   : > { %v315_v31 = vpop.xlane.xlu1 %314  ;;  %v324_v36 = vpop.xlane.xlu2 %323  ;;  %v1364_v37 = vmul.f32 %v1361_v35, %v946_v30  ;;  %v360_v38 = vmul.f32 %v1361_v35, %v321_v26  ;;  %vm365_vm14 = vweird.f32 %v1361_v35  ;;  %v371_v26 = vor.u32 1.1754944e-38, %v370_v60 }
 0x329   : > { %949 = vrcp.f32 %v315_v31  ;;  %v338_v48 = vand.u32 2147483647, %v315_v31  ;;  %v340_v49 = vand.u32 2147483648, %v315_v31  ;;  %vm334_vm15 = vweird.f32 %v315_v31  ;;  %vm1396_vm5 = vmor %vm364_vm9, %vm365_vm14 }
 0x32a   : > { %951 = vrcp.f32 %v324_v36  ;;  %v361_v41 = vsub.f32 1.0, %v360_v38  ;;  %vm379_vm6 = vweird.f32 %v324_v36  ;;  %v383_v15 = vand.u32 2147483647, %v324_v36 }
 0x32b   : > { %vm1387_vm3 = vcmp.eq.f32.partialorder %v338_v48, 8.507059e+37  ;;  %v341_v0 = vor.u32 1.1754944e-38, %v340_v49  ;;  %v385_v16 = vand.u32 2147483648, %v324_v36  ;;  %vm369_vm9 = vcmp.eq.f32.partialorder %v368_v57, 8.507059e+37 }
 0x32c   : > { %v362_v10 = vmul.f32 %v1361_v35, %v361_v41 }
 0x32d   : > { %v386_v38 = vor.u32 1.1754944e-38, %v385_v16 }
 0x32e   : > { %v363_v54 = vadd.f32 %v1361_v35, %v362_v10 }
 0x32f   : > { %v1367_v8 = vpop.eup %949 }
 0x330   : > { %v330_v39 = vmul.f32 %v1367_v8, %v315_v31  ;;  %v1370_v40 = vpop.eup %951  ;;  %v318_v45 = vpop.xlane.xlu2 %317  ;;  %vm335_vm8 = vweird.f32 %v1367_v8  ;;  %v367_v20 = vsel %vm1396_vm5, %v1361_v35, %v363_v54 }
 0x331   : > { %v375_v43 = vmul.f32 %v1370_v40, %v324_v36  ;;  %953 = vrcp.f32 %v318_v45  ;;  %vm1383_vm2 = vmor %vm334_vm15, %vm335_vm8  ;;  %vm380_vm4 = vweird.f32 %v1370_v40  ;;  %v355_v19 = vand.u32 2147483648, %v318_v45 }
 0x332   : > { %v331_v42 = vsub.f32 1.0, %v330_v39  ;;  %v353_v28 = vand.u32 2147483647, %v318_v45  ;;  %vm381_vm8 = vmor %vm379_vm6, %vm380_vm4  ;;  %vm349_vm14 = vweird.f32 %v318_v45  ;;  %v372_v36 = vsel %vm369_vm9, %v371_v26, %v367_v20 }
 0x333   : > { %v376_v47 = vsub.f32 1.0, %v375_v43  ;;  %v356_v39 = vor.u32 1.1754944e-38, %v355_v19 }
 0x334   : > { %v332_v46 = vmul.f32 %v1367_v8, %v331_v42  ;;  %vm354_vm5 = vcmp.eq.f32.partialorder %v353_v28, 8.507059e+37 }
 0x335   : > { %v377_v51 = vmul.f32 %v1370_v40, %v376_v47  ;;  %v391_v47 = vmul.f32 %v1329_v50, %v372_v36  ;;  %v587_v36 = vcvt.f32.s32 %v1354_v13 }
 0x336   : > { %v333_v12 = vadd.f32 %v1367_v8, %v332_v46 }
 0x337   : > { %v1378_v52 = vpop.eup %953  ;;  %v378_v2 = vadd.f32 %v1370_v40, %v377_v51 }
 0x338   : > { %v345_v56 = vmul.f32 %v1378_v52, %v318_v45  ;;  %v337_v1 = vsel %vm1383_vm2, %v1367_v8, %v333_v12  ;;  %vm350_vm7 = vweird.f32 %v1378_v52  ;;  %vm384_vm2 = vcmp.eq.f32.partialorder %v383_v15, 8.507059e+37 }
 0x339   : > { %v342_v29 = vsel %vm1387_vm3, %v341_v0, %v337_v1  ;;  %v382_v30 = vsel %vm381_vm8, %v1370_v40, %v378_v2  ;;  %vm351_vm15 = vmor %vm349_vm14, %vm350_vm7  ;;  %vm406_vm3 = vcmask 122880   ;;  %v490_v0 = vmul.f32 1.442695, %v484_v63 }
 0x33a   : > { %v346_v3 = vsub.f32 1.0, %v345_v56  ;;  %v389_v41 = vmul.f32 %v1335_v53, %v342_v29  ;;  %v387_v43 = vsel %vm384_vm2, %v386_v38, %v382_v30  ;;  %v396_v53 = vsel %vm288_vm1, %v391_v47, 0.0 }
 0x33b   : > { %v392_v45 = vmul.f32 %v1337_v55, %v387_v43  ;;  %955 = vpow2.f32 %v490_v0  ;;  %v482_v1 = vsub.f32 %v1235_v24, %v1235_v24  ;;  %v572_v2 = vcvt.f32.s32 %v1347_v62 }
 0x33c   : > { %v347_v25 = vmul.f32 %v1378_v52, %v346_v3  ;;  %v393_v48 = vsel %vm288_vm1, %v389_v41, 0.0  ;;  %v485_v3 = vsub.f32 %v1233_v23, %v1233_v23  ;;  %v597_v15 = vsub.f32 %v1309_v34, %v1233_v23 }
 0x33d   : > { %v398_v54 = vsel %vm288_vm1, %v392_v45, 0.0  ;;  %v486_v20 = vmul.f32 1.442695, %v482_v1  ;;  %v573_v18 = vshll.u32 %v572_v2, 16  ;;  %v598_v29 = vmul.f32 1.442695, %v594_v5 }
 0x33e   : > { %v348_v31 = vadd.f32 %v1378_v52, %v347_v25  ;;  %v492_v28 = vmul.f32 1.442695, %v485_v3  ;;  %v604_v62 = vmul.f32 1.442695, %v597_v15  ;;  %v542_v34 = vcvt.f32.s32 %v1352_v4 }
 0x33f   : > { %957 = vpow2.f32 %v486_v20  ;;  %v600_v41 = vmul.f32 1.442695, %v595_v32  ;;  %v588_v47 = vshll.u32 %v587_v36, 16  ;;  %v1069_v1 = vmov 0.0  }
 0x340   : > { %v352_v42 = vsel %vm351_vm15, %v1378_v52, %v348_v31  ;;  %v483_v31 = vsub.f32 %v1245_v33, %v1245_v33  ;;  %959 = vpow2.f32 %v492_v28 }
 0x341   : > { %v357_v46 = vsel %vm354_vm5, %v356_v39, %v352_v42  ;;  %v956_v19 = vpop.eup %955  ;;  %961 = vpow2.f32 %v598_v29  ;;  %v543_v42 = vshll.u32 %v542_v34, 16 }
 0x342   : > { %v390_v10 = vmul.f32 %v1343_v14, %v357_v46  ;;  %v496_v26 = vmul.f32 %v956_v19, %v1361_v35  ;;  %963 = vpow2.f32 %v604_v62  ;;  %v488_v38 = vmul.f32 1.442695, %v483_v31 }
 0x344   : > { %v394_v49 = vsel %vm288_vm1, %v390_v10, 0.0  ;;  %v500_v23 = vsel %vm480_vm10, %v496_v26, 0.0  ;;  %965 = vpow2.f32 %v488_v38 }
 0x345   : > { %v395_v12 = vadd.f32 %v394_v49, %v393_v48  ;;  %v958_v58 = vpop.eup %957  ;;  %967 = vpow2.f32 %v600_v41 }
 0x346   : > { %v494_v33 = vmul.f32 %v958_v58, %v1367_v8 }
 0x347   : > { %v397_v51 = vadd.f32 %v396_v53, %v395_v12  ;;  %v557_v12 = vcvt.f32.s32 %v1358_v27 }
 0x349   : > { %v399_v56 = vadd.f32 %v398_v54, %v397_v51  ;;  %v498_v51 = vsel %vm478_vm11, %v494_v33, 0.0 }
 0x34b   : > { %v400_v57 = vrot.slane %v399_v56, 4 }
 0x34d   : > { %v401_v60 = vadd.f32 %v400_v57, %v399_v56 }
 0x34f   : > { %v402_v61 = vrot.slane %v401_v60, 2 }
 0x351   : > { %v403_v50 = vadd.f32 %v402_v61, %v401_v60 }
 0x353   : > { %v404_v55 = vrot.slane %v403_v50, 1 }
 0x355   : > { %v405_v14 = vadd.f32 %v404_v55, %v403_v50  ;;  %v558_v50 = vshll.u32 %v557_v12, 16 }
 0x357   : > { %407 = vst.msk [vmem:[%s234_s29] sm:$0x1] %vm406_vm3, %v405_v14 }
 0x386   : > { %v570_v16 = vpop.xlane.xlu0 %569 }
 0x387   : > { %v571_v25 = vcvt.f32.s32 %v570_v16 }
 0x389   : > { %v574_v30 = vadd.s32 %v573_v18, %v571_v25 }
 0x38b   : > { %vm592_vm4 = vcmp.eq.s32.totalorder %v1225_v17, %v574_v30 }
 0x38c   : > { %v612_v24 = vsel %vm592_vm4, %v1364_v37, 0.0  ;;  %v960_v37 = vpop.eup %959  ;;  %v620_v6 = vsel %vm592_vm4, -inf, %v1259_v59 }
 0x38d   : > { %v616_v35 = vadd.f32 %v612_v24, %v500_v23  ;;  %v962_v44 = vpop.eup %961  ;;  %v497_v45 = vmul.f32 %v960_v37, %v1370_v40 }
 0x38e   : > { %v540_v39 = vpop.xlane.xlu0 %539  ;;  %v585_v43 = vpop.xlane.xlu1 %584  ;;  %v606_v49 = vmul.f32 %v962_v44, %v1367_v8 }
 0x38f   : > { %870 = vmatmul.msk.f32.vlgmr.msra.gmra.mxu2 %vm288_vm1, %v616_v35  ;;  %v541_v46 = vcvt.f32.s32 %v540_v39  ;;  %v586_v10 = vcvt.f32.s32 %v585_v43  ;;  %v964_v13 = vpop.eup %963  ;;  %v501_v8 = vsel %vm481_vm12, %v497_v45, 0.0  ;;  %vm624_vm12 = vcmp.eq.f32.partialorder %v620_v6, -inf }
 0x390   : > { %v609_v53 = vmul.f32 %v964_v13, %v1370_v40  ;;  %v966_v61 = vpop.eup %965  ;;  %v866_v16 = vsel %vm624_vm12, 1.0, %v1069_v1 }
 0x391   : > { %v544_v4 = vadd.s32 %v543_v42, %v541_v46  ;;  %v589_v48 = vadd.s32 %v588_v47, %v586_v10  ;;  %v495_v14 = vmul.f32 %v966_v61, %v1378_v52  ;;  %v968_v63 = vpop.eup %967 }
 0x392   : > { %v607_v0 = vmul.f32 %v968_v63, %v1378_v52 }
 0x393   : > { %vm590_vm10 = vcmp.eq.s32.totalorder %v1225_v17, %v544_v4  ;;  %vm593_vm6 = vcmp.eq.s32.totalorder %v1225_v17, %v589_v48  ;;  %v499_v5 = vsel %vm479_vm13, %v495_v14, 0.0 }
 0x394   : > { %v610_v54 = vsel %vm590_vm10, %v606_v49, 0.0  ;;  %v613_v56 = vsel %vm593_vm6, %v609_v53, 0.0  ;;  %v618_v27 = vsel %vm590_vm10, -inf, %v1275_v9  ;;  %v621_v9 = vsel %vm593_vm6, -inf, %v1281_v11 }
 0x395   : > { %v614_v57 = vadd.f32 %v610_v54, %v498_v51  ;;  %v617_v60 = vadd.f32 %v613_v56, %v501_v8  ;;  %vm622_vm11 = vcmp.eq.f32.partialorder %v618_v27, -inf  ;;  %vm625_vm8 = vcmp.eq.f32.partialorder %v621_v9, -inf }
 0x396   : > { %v555_v40 = vpop.xlane.xlu0 %554  ;;  %v864_v2 = vsel %vm622_vm11, 1.0, %v1069_v1  ;;  %v867_v20 = vsel %vm625_vm8, 1.0, %v1069_v1 }
 0x397   : > { %v556_v55 = vcvt.f32.s32 %v555_v40  ;;  %868 = vmatmul.msk.f32.vlgmr.msra.gmra.mxu1 %vm288_vm1, %v614_v57  ;;  %871 = vmatmul.msk.f32.gmra.mxu2 %vm288_vm1, %v617_v60  ;;  %v634_v52 = vsel %vm288_vm1, %v864_v2, 0.0  ;;  %v639_v21 = vsel %vm288_vm1, %v867_v20, 0.0 }
 0x399   : > { %v559_v7 = vadd.s32 %v558_v50, %v556_v55 }
 0x39b   : > { %vm591_vm7 = vcmp.eq.s32.totalorder %v1225_v17, %v559_v7 }
 0x39c   : > { %v611_v3 = vsel %vm591_vm7, %v607_v0, 0.0  ;;  %v619_v59 = vsel %vm591_vm7, -inf, %v1295_v22  ;;  %v637_v22 = vsel %vm288_vm1, %v866_v16, 0.0 }
 0x39d   : > { %vm623_vm9 = vcmp.eq.f32.partialorder %v619_v59, -inf  ;;  %v615_v15 = vadd.f32 %v611_v3, %v499_v5 }
 0x39e   : > { %v865_v11 = vsel %vm623_vm9, 1.0, %v1069_v1 }
 0x39f   : > { %v635_v19 = vsel %vm288_vm1, %v865_v11, 0.0  ;;  %869 = vmatmul.msk.f32.gmra.mxu1 %vm288_vm1, %v615_v15 }
 0x3a0   : > { %v636_v18 = vadd.f32 %v635_v19, %v634_v52 }
 0x3a2   : > { %v638_v17 = vadd.f32 %v637_v22, %v636_v18 }
 0x3a4   : > { %v640_v25 = vadd.f32 %v639_v21, %v638_v17 }
 0x3a6   : > { %v641_v28 = vrot.slane %v640_v25, 4 }
 0x3a8   : > { %v642_v26 = vadd.f32 %v641_v28, %v640_v25 }
 0x3aa   : > { %v643_v29 = vrot.slane %v642_v26, 2 }
 0x3ac   : > { %v644_v30 = vadd.f32 %v643_v29, %v642_v26 }
 0x3ae   : > { %v645_v62 = vrot.slane %v644_v30, 1 }
 0x3b0   : > { %v646_v31 = vadd.f32 %v645_v62, %v644_v30 }
 0x3b2   : > { %647 = vst.msk [vmem:[%s237_s14] sm:$0x1] %vm406_vm3, %v646_v31 }
 0x412   : > { %v700_v23 = vpop.f32.mrf.mxu2 }
 0x413   : > { %708 = vst.msk [vmem:[%s219_s9 + $0x10] sm:$0xff] %vm246_vm0, %v700_v23 }
 0x414   : > { %v671_v24 = vpop.f32.mrf.mxu1 }
 0x415   : > { %706 = vst.msk [vmem:[%s219_s9] sm:$0xff] %vm246_vm0, %v671_v24 }
 0x41a   : > { %v703_v32 = vpop.f32.mrf.mxu2 }
 0x41b   : > { %709 = vst.msk [vmem:[%s219_s9 + $0x18] sm:$0xff] %vm246_vm0, %v703_v32 }
 0x41c   : > { %v674_v34 = vpop.f32.mrf.mxu1 }
 0x41d   : > { %707 = vst.msk [vmem:[%s219_s9 + $0x8] sm:$0xff] %vm246_vm0, %v674_v34 }
 0x41e   : > { %1026 = shalt.err (!%p1023_p7)
}
 0x41f   : > { %s1070_s7 = smov 128   ;;  %s1071_s10 = smov 8  }
 0x420   : > { %888 = dma.vmem_to_hbm [thread:$0]  (%p1147_p11), %s731_s22, 512, %s733_s26, %s711_s8, %s1070_s7, %s1070_s7, %s1071_s10  }
 0x421 PF: > { %s753_s14 = sand.u32 1, %s1053_s15   ;;  %p1549_p5 = scmp.ge.s32.totalorder %s1065_s18, 2 }
 0x422   : > { %s754_s9 = scalar_lea.sflag [#allocation4], %s753_s14 }
 0x423   : > { %p895_p8 = pnand %p1549_p5, %p1151_p12 }
 0x425   : > { %p896_p10 = pneg %p895_p8 }
 0x427   : > { %1048 = dma.done.wait (%p896_p10), %s754_s9, 512  }
 0x428   : > { %1050 = vsyncadd (%p896_p10), %s754_s9, 4294966784  ;;  %p18_p2 = scmp.ge.s32.totalorder %s1122_s21, 4   ;;  %s1550_s15 = smov %s1057_s16 }
 0x429   : > { %s1551_s16 = smov %s1061_s17  ;;  %s1552_s17 = smov %s1134_s24 }
 0x42a   : > { %s1553_s18 = smov %s1122_s21  ;;  %20 = sbr.rel (!%p18_p2) target bundleno = 5 (0x5), region = 97 }
 0x42f   :  { %772 = vsyncpa [#allocation3], 1 }
 0x430   :  { %774 = vsyncpa [#allocation3 + $0x1], 1 }
 0x431   :  { %775 = vsyncpa [#allocation4], 1 }
 0x432   :  { %777 = vsyncpa [#allocation4 + $0x1], 1 }

</bundles_post_ra>
